<compile_context>
chip_gen: v7x
topology: tpu7x:2x2x1
jax: 0.10.0
libtpu: 0.0.40
codegen_flags: <defaults>
</compile_context>

<pallas_src>
import functools

import jax
import jax.numpy as jnp
from jax import lax
from jax.experimental import pallas as pl
from jax.experimental.pallas import tpu as pltpu

PAD = 128          # lane-dense padding for hidden / class dims
MAX_TILE_N = 512   # node-tile rows (bf16 sublane aligned)


def _round_up(x, m):
    return ((x + m - 1) // m) * m


# ----------------------------- Pallas kernel ------------------------------ #
def robust_model_kernel(x_ref, w_ref, b_ref, out_ref, acc_ref, *, n_true, tile_n):
    """One node tile per grid step.

    x_ref   : (tile_n, d_in)  bf16  -- node features, tiled over grid axis 0
    w_ref   : (PAD, 6*PAD)    bf16  -- 6 BN-folded weight blocks, VMEM-resident
    b_ref   : (1, 6*PAD)      f32   -- 6 BN-folded bias rows,   VMEM-resident
    out_ref : (2, PAD)        f32   -- row 0 = logits (padded), row 1 = graph repr
    acc_ref : (1, PAD)        f32   -- running sum of h2 over nodes (mean pool)
    """
    i = pl.program_id(0)
    last = pl.num_programs(0) - 1
    P = PAD

    def W(k):                                  # static, 128-lane-aligned slice
        return w_ref[:, k * P:(k + 1) * P]

    def B(k):
        return b_ref[:, k * P:(k + 1) * P]

    @pl.when(i == 0)
    def _():
        acc_ref[...] = jnp.zeros_like(acc_ref)

    x = x_ref[...]                                             # (tile_n, d_in) bf16
    d_in = x.shape[1]
    w0 = w_ref[:d_in, 0:P]                                     # only the used rows of W(0)

    # conv1 (BN folded): Linear -> ReLU -> Dropout(eval = identity)
    h0 = jnp.maximum(
        jnp.dot(x, w0, preferred_element_type=jnp.float32) + B(0), 0.0)

    # gin1: Linear -> BN(folded) -> ReLU -> Linear ; residual add
    a1 = jnp.maximum(
        jnp.dot(h0.astype(jnp.bfloat16), W(1),
                preferred_element_type=jnp.float32) + B(1), 0.0)
    h1 = (jnp.dot(a1.astype(jnp.bfloat16), W(2),
                  preferred_element_type=jnp.float32) + B(2)) + h0

    # gin2: Linear -> BN(folded) -> ReLU -> Linear ; residual add
    a2 = jnp.maximum(
        jnp.dot(h1.astype(jnp.bfloat16), W(3),
                preferred_element_type=jnp.float32) + B(3), 0.0)
    h2 = (jnp.dot(a2.astype(jnp.bfloat16), W(4),
                  preferred_element_type=jnp.float32) + B(4)) + h1

    # Padded rows see ReLU(bias) != 0 after the bias broadcast -> mask them out
    # of the pool.  Only emitted when padding actually exists (trace-time check).
    if n_true % tile_n != 0:
        row = lax.broadcasted_iota(jnp.int32, (tile_n, 1), 0) + i * tile_n
        h2 = h2 * (row < n_true).astype(jnp.float32)

    acc_ref[...] += jnp.sum(h2, axis=0, keepdims=True)

    @pl.when(i == last)
    def _():
        graph = acc_ref[...] * jnp.float32(1.0 / n_true)                      # (1, P)
        logits = jnp.dot(graph.astype(jnp.bfloat16), W(5),
                         preferred_element_type=jnp.float32) + B(5)           # (1, P)
        out_ref[0:1, :] = logits
        out_ref[1:2, :] = graph


# --------------------------- parameter handling ---------------------------- #
def make_params(key, input_dim, hidden_dim, num_classes):
    """Deterministic PyTorch-Linear-style init + fresh BatchNorm stats."""
    def linear(k, fan_in, fan_out):
        k_w, k_b = jax.random.split(k)
        lim = 1.0 / jnp.sqrt(jnp.float32(fan_in))
        w = jax.random.uniform(k_w, (fan_in, fan_out), jnp.float32, -lim, lim)
        b = jax.random.uniform(k_b, (1, fan_out), jnp.float32, -lim, lim)
        return w, b

    def bn_folded(dim, eps=1e-5):
        # gamma=1, beta=0, running_mean=0, running_var=1 (fresh BatchNorm1d, eval)
        scale = jnp.full((1, dim), 1.0 / jnp.sqrt(1.0 + eps), jnp.float32)
        shift = jnp.zeros((1, dim), jnp.float32)
        return scale, shift

    keys = jax.random.split(key, 6)
    w1, b1 = linear(keys[0], input_dim, hidden_dim)
    s1, t1 = bn_folded(hidden_dim)
    wa1, ba1 = linear(keys[1], hidden_dim, hidden_dim)
    sa1, ta1 = bn_folded(hidden_dim)
    wb1, bb1 = linear(keys[2], hidden_dim, hidden_dim)
    wa2, ba2 = linear(keys[3], hidden_dim, hidden_dim)
    sa2, ta2 = bn_folded(hidden_dim)
    wb2, bb2 = linear(keys[4], hidden_dim, hidden_dim)
    wc, bc = linear(keys[5], hidden_dim, num_classes)

    return (w1, b1, s1, t1,
            wa1, ba1, sa1, ta1, wb1, bb1,
            wa2, ba2, sa2, ta2, wb2, bb2,
            wc, bc)


def fold_and_pack(params, pad=PAD):
    """Fold eval-mode BN into Linear weights, zero-pad to 128 lanes, pack into
    one bf16 weight slab (pad, 6*pad) and one f32 bias slab (1, 6*pad)."""
    (w1, b1, s1, t1,
     wa1, ba1, sa1, ta1, wb1, bb1,
     wa2, ba2, sa2, ta2, wb2, bb2,
     wc, bc) = params

    def fold(w, b, s, t):  # exact: BN(eval) after Linear == Linear with w*s, b*s+t
        return w * s, b * s + t

    w1f, b1f = fold(w1, b1, s1, t1)
    wa1f, ba1f = fold(wa1, ba1, sa1, ta1)
    wa2f, ba2f = fold(wa2, ba2, sa2, ta2)

    def pad_w(w):
        out = jnp.zeros((pad, pad), jnp.float32)
        return out.at[:w.shape[0], :w.shape[1]].set(w)

    def pad_b(b):
        out = jnp.zeros((1, pad), jnp.float32)
        return out.at[:, :b.shape[1]].set(b)

    ws = [w1f, wa1f, wb1, wa2f, wb2, wc]
    bs = [b1f, ba1f, bb1, ba2f, bb2, bc]
    w_slab = jnp.concatenate([pad_w(w) for w in ws], axis=1).astype(jnp.bfloat16)
    b_slab = jnp.concatenate([pad_b(b) for b in bs], axis=1)  # stays f32
    return w_slab, b_slab


# ------------------------------ JAX wrapper -------------------------------- #
@functools.partial(jax.jit, static_argnames=("hidden_dim", "num_classes"))
def robust_model_forward(x, edge_index, w_slab, b_slab, *, hidden_dim, num_classes):
    del edge_index  # accepted but unused, matching the PyTorch forward
    n, d_in = x.shape
    pad = w_slab.shape[0]

    tile_n = min(MAX_TILE_N, _round_up(n, 16))   # bf16-sublane-aligned node tile
    n_pad = _round_up(n, tile_n)
    grid = (n_pad // tile_n,)

    # bf16 LHS at the TRUE feature width (no 128-lane inflation of HBM traffic);
    # only the node axis is padded up to a whole number of tiles.
    x_p = jnp.zeros((n_pad, d_in), jnp.bfloat16).at[:n].set(x.astype(jnp.bfloat16))

    flops = 2 * n_pad * (d_in * pad + 4 * pad * pad) + 2 * pad * pad
    bytes_accessed = (n_pad * d_in * 2          # x tiles (bf16)
                      + pad * 6 * pad * 2       # weight slab (bf16)
                      + 6 * pad * 4             # bias slab (f32)
                      + 2 * pad * 4)            # merged output (f32)

    kernel = functools.partial(robust_model_kernel, n_true=n, tile_n=tile_n)
    out = pl.pallas_call(
        kernel,
        out_shape=jax.ShapeDtypeStruct((2, pad), jnp.float32),
        grid=grid,
        in_specs=[
            pl.BlockSpec((tile_n, d_in), lambda i: (i, 0)),   # streamed node tiles
            pl.BlockSpec((pad, 6 * pad), lambda i: (0, 0)),   # weight slab, resident
            pl.BlockSpec((1, 6 * pad), lambda i: (0, 0)),     # bias slab,   resident
        ],
        out_specs=pl.BlockSpec((2, pad), lambda i: (0, 0)),   # single merged output
        scratch_shapes=[pltpu.VMEM((1, pad), jnp.float32)],   # mean-pool accumulator
        compiler_params=pltpu.CompilerParams(
            dimension_semantics=("arbitrary",)),              # axis carries accumulator
        cost_estimate=pl.CostEstimate(
            flops=flops, transcendentals=0, bytes_accessed=bytes_accessed),
    )(x_p, w_slab, b_slab)

    # split the merged output and drop padded lanes outside the kernel
    return out[0:1, :num_classes], out[1:2, :hidden_dim]


def reference_forward(x, params):
    """Pure-JAX f32 reference with the ORIGINAL (un-folded, un-packed) params."""
    (w1, b1, s1, t1,
     wa1, ba1, sa1, ta1, wb1, bb1,
     wa2, ba2, sa2, ta2, wb2, bb2,
     wc, bc) = params
    h0 = jnp.maximum((x @ w1 + b1) * s1 + t1, 0.0)
    a1 = jnp.maximum((h0 @ wa1 + ba1) * sa1 + ta1, 0.0)
    h1 = (a1 @ wb1 + bb1) + h0
    a2 = jnp.maximum((h1 @ wa2 + ba2) * sa2 + ta2, 0.0)
    h2 = (a2 @ wb2 + bb2) + h1
    graph = jnp.mean(h2, axis=0, keepdims=True)
    return graph @ wc + bc, graph


if __name__ == "__main__":
    # Small shapes consistent with the module: N nodes with input_dim features.
    num_nodes, input_dim, hidden_dim, num_classes = 8, 16, 32, 4

    key = jax.random.PRNGKey(0)
    k_x, k_p = jax.random.split(key)
    x = jax.random.normal(k_x, (num_nodes, input_dim), jnp.float32)
    # edge_index is unused by the PyTorch forward (the "GIN" blocks are plain MLPs).
    edge_index = jnp.zeros((2, num_nodes), jnp.int32)
    # TODO(synk): no message passing is performed, matching the reference forward.

    params = make_params(k_p, input_dim, hidden_dim, num_classes)
    w_slab, b_slab = fold_and_pack(params)

    logits, graph_repr = robust_model_forward(
        x, edge_index, w_slab, b_slab,
        hidden_dim=hidden_dim, num_classes=num_classes)
    jax.block_until_ready((logits, graph_repr))

    ref_logits, ref_graph = reference_forward(x, params)
    assert logits.shape == (1, num_classes) and graph_repr.shape == (1, hidden_dim)
    # bf16 MXU operands vs f32 reference -> tolerance sized for bf16 rounding.
    assert jnp.allclose(logits, ref_logits, atol=2e-2, rtol=2e-2)
    assert jnp.allclose(graph_repr, ref_graph, atol=2e-2, rtol=2e-2)

    print("KERNEL_OK")
</pallas_src>

<mosaic_0001>
module attributes {stable_mosaic.version = 11 : i64} {
  func.func @robust_model_kernel(%arg0: i32, %arg1: memref<16x16xbf16, #tpu.memory_space<vmem>>, %arg2: memref<128x768xbf16, #tpu.memory_space<vmem>>, %arg3: memref<1x768xf32, #tpu.memory_space<vmem>>, %arg4: memref<2x128xf32, #tpu.memory_space<vmem>>, %arg5: memref<1x128xf32, #tpu.memory_space<vmem>>) attributes {dimension_semantics = [#tpu.dimension_semantics<arbitrary>], iteration_bounds = array<i64: 1>, scalar_prefetch = 0 : i64, scratch_operands = 1 : i64, tpu.core_type = #tpu.core_type<tc>, window_params = [{transform_indices = @transform_0, window_bounds = array<i64: 16, 16>}, {pipeline_mode = #tpu.pipeline_mode<synchronous>, transform_indices = @transform_1, window_bounds = array<i64: 128, 768>}, {pipeline_mode = #tpu.pipeline_mode<synchronous>, transform_indices = @transform_2, window_bounds = array<i64: 1, 768>}, {pipeline_mode = #tpu.pipeline_mode<synchronous>, transform_indices = @transform_3, window_bounds = array<i64: 2, 128>}]} {
    %c0_i32 = arith.constant 0 : i32
    %0 = arith.cmpi eq, %arg0, %c0_i32 : i32
    %1 = arith.extui %0 : i1 to i32
    %c0_i32_0 = arith.constant 0 : i32
    %2 = arith.cmpi ne, %1, %c0_i32_0 : i32
    scf.if %2 {
      %cst_32 = arith.constant 0.000000e+00 : f32
      %59 = vector.broadcast %cst_32 : f32 to vector<1x128xf32>
      %c0_33 = arith.constant 0 : index
      %c0_34 = arith.constant 0 : index
      %60 = vector.load %arg5[%c0_33, %c0_34] : memref<1x128xf32, #tpu.memory_space<vmem>>, vector<1x128xf32>
      tpu.vector_store %arg5[%c0_33, %c0_34], %59 {strides = array<i32>} : memref<1x128xf32, #tpu.memory_space<vmem>>, vector<1x128xf32>,
    } else {
    }
    %c0 = arith.constant 0 : index
    %c0_1 = arith.constant 0 : index
    %3 = vector.load %arg1[%c0, %c0_1] : memref<16x16xbf16, #tpu.memory_space<vmem>>, vector<16x16xbf16>
    %c0_2 = arith.constant 0 : index
    %c0_3 = arith.constant 0 : index
    %4 = vector.load %arg2[%c0_2, %c0_3] : memref<128x768xbf16, #tpu.memory_space<vmem>>, vector<16x128xbf16>
    %cst = arith.constant dense<0.000000e+00> : vector<16x128xf32>
    %5 = tpu.matmul %3, %4, %cst {dimension_numbers = #tpu.dot_dimension_numbers<[1], [0], [0], [1], [0, 0, 1, 1], [], []>} : vector<16x16xbf16>, vector<16x128xbf16>, vector<16x128xf32> -> vector<16x128xf32>
    %c0_4 = arith.constant 0 : index
    %c0_5 = arith.constant 0 : index
    %6 = vector.load %arg3[%c0_4, %c0_5] : memref<1x768xf32, #tpu.memory_space<vmem>>, vector<1x128xf32>
    %7 = vector.broadcast %6 : vector<1x128xf32> to vector<16x128xf32>
    %8 = arith.addf %5, %7 : vector<16x128xf32>
    %cst_6 = arith.constant 0.000000e+00 : f32
    %9 = vector.broadcast %cst_6 : f32 to vector<16x128xf32>
    %10 = arith.maximumf %8, %9 : vector<16x128xf32>
    %11 = arith.truncf %10 : vector<16x128xf32> to vector<16x128xbf16>
    %c0_7 = arith.constant 0 : index
    %c128 = arith.constant 128 : index
    %12 = vector.load %arg2[%c0_7, %c128] : memref<128x768xbf16, #tpu.memory_space<vmem>>, vector<128x128xbf16>
    %cst_8 = arith.constant dense<0.000000e+00> : vector<16x128xf32>
    %13 = tpu.matmul %11, %12, %cst_8 {dimension_numbers = #tpu.dot_dimension_numbers<[1], [0], [0], [1], [0, 0, 1, 1], [], []>} : vector<16x128xbf16>, vector<128x128xbf16>, vector<16x128xf32> -> vector<16x128xf32>
    %c0_9 = arith.constant 0 : index
    %c128_10 = arith.constant 128 : index
    %14 = vector.load %arg3[%c0_9, %c128_10] : memref<1x768xf32, #tpu.memory_space<vmem>>, vector<1x128xf32>
    %15 = vector.broadcast %14 : vector<1x128xf32> to vector<16x128xf32>
    %16 = arith.addf %13, %15 : vector<16x128xf32>
    %cst_11 = arith.constant 0.000000e+00 : f32
    %17 = vector.broadcast %cst_11 : f32 to vector<16x128xf32>
    %18 = arith.maximumf %16, %17 : vector<16x128xf32>
    %19 = arith.truncf %18 : vector<16x128xf32> to vector<16x128xbf16>
    %c0_12 = arith.constant 0 : index
    %c256 = arith.constant 256 : index
    %20 = vector.load %arg2[%c0_12, %c256] : memref<128x768xbf16, #tpu.memory_space<vmem>>, vector<128x128xbf16>
    %cst_13 = arith.constant dense<0.000000e+00> : vector<16x128xf32>
    %21 = tpu.matmul %19, %20, %cst_13 {dimension_numbers = #tpu.dot_dimension_numbers<[1], [0], [0], [1], [0, 0, 1, 1], [], []>} : vector<16x128xbf16>, vector<128x128xbf16>, vector<16x128xf32> -> vector<16x128xf32>
    %c0_14 = arith.constant 0 : index
    %c256_15 = arith.constant 256 : index
    %22 = vector.load %arg3[%c0_14, %c256_15] : memref<1x768xf32, #tpu.memory_space<vmem>>, vector<1x128xf32>
    %23 = vector.broadcast %22 : vector<1x128xf32> to vector<16x128xf32>
    %24 = arith.addf %21, %23 : vector<16x128xf32>
    %25 = arith.addf %24, %10 : vector<16x128xf32>
    %26 = arith.truncf %25 : vector<16x128xf32> to vector<16x128xbf16>
    %c0_16 = arith.constant 0 : index
    %c384 = arith.constant 384 : index
    %27 = vector.load %arg2[%c0_16, %c384] : memref<128x768xbf16, #tpu.memory_space<vmem>>, vector<128x128xbf16>
    %cst_17 = arith.constant dense<0.000000e+00> : vector<16x128xf32>
    %28 = tpu.matmul %26, %27, %cst_17 {dimension_numbers = #tpu.dot_dimension_numbers<[1], [0], [0], [1], [0, 0, 1, 1], [], []>} : vector<16x128xbf16>, vector<128x128xbf16>, vector<16x128xf32> -> vector<16x128xf32>
    %c0_18 = arith.constant 0 : index
    %c384_19 = arith.constant 384 : index
    %29 = vector.load %arg3[%c0_18, %c384_19] : memref<1x768xf32, #tpu.memory_space<vmem>>, vector<1x128xf32>
    %30 = vector.broadcast %29 : vector<1x128xf32> to vector<16x128xf32>
    %31 = arith.addf %28, %30 : vector<16x128xf32>
    %cst_20 = arith.constant 0.000000e+00 : f32
    %32 = vector.broadcast %cst_20 : f32 to vector<16x128xf32>
    %33 = arith.maximumf %31, %32 : vector<16x128xf32>
    %34 = arith.truncf %33 : vector<16x128xf32> to vector<16x128xbf16>
    %c0_21 = arith.constant 0 : index
    %c512 = arith.constant 512 : index
    %35 = vector.load %arg2[%c0_21, %c512] : memref<128x768xbf16, #tpu.memory_space<vmem>>, vector<128x128xbf16>
    %cst_22 = arith.constant dense<0.000000e+00> : vector<16x128xf32>
    %36 = tpu.matmul %34, %35, %cst_22 {dimension_numbers = #tpu.dot_dimension_numbers<[1], [0], [0], [1], [0, 0, 1, 1], [], []>} : vector<16x128xbf16>, vector<128x128xbf16>, vector<16x128xf32> -> vector<16x128xf32>
    %c0_23 = arith.constant 0 : index
    %c512_24 = arith.constant 512 : index
    %37 = vector.load %arg3[%c0_23, %c512_24] : memref<1x768xf32, #tpu.memory_space<vmem>>, vector<1x128xf32>
    %38 = vector.broadcast %37 : vector<1x128xf32> to vector<16x128xf32>
    %39 = arith.addf %36, %38 : vector<16x128xf32>
    %40 = arith.addf %39, %25 : vector<16x128xf32>
    %41 = tpu.iota {dimensions = array<i32: 0>} : vector<16x1xi32>
    %c16_i32 = arith.constant 16 : i32
    %42 = arith.muli %arg0, %c16_i32 : i32
    %43 = vector.broadcast %42 : i32 to vector<16x1xi32>
    %44 = arith.addi %41, %43 : vector<16x1xi32>
    %c8_i32 = arith.constant 8 : i32
    %45 = vector.broadcast %c8_i32 : i32 to vector<16x1xi32>
    %46 = arith.cmpi slt, %44, %45 : vector<16x1xi32>
    %47 = arith.extui %46 : vector<16x1xi1> to vector<16x1xi32>
    %48 = arith.sitofp %47 : vector<16x1xi32> to vector<16x1xf32>
    %49 = vector.broadcast %48 : vector<16x1xf32> to vector<16x128xf32>
    %50 = arith.mulf %40, %49 : vector<16x128xf32>
    %c0_25 = arith.constant 0 : index
    %c0_26 = arith.constant 0 : index
    %51 = vector.load %arg5[%c0_25, %c0_26] : memref<1x128xf32, #tpu.memory_space<vmem>>, vector<1x128xf32>
    %cst_27 = arith.constant dense<0.000000e+00> : vector<128xf32>
    %52 = vector.multi_reduction <add>, %50, %cst_27 [0] : vector<16x128xf32> to vector<128xf32>
    %53 = vector.shape_cast %52 : vector<128xf32> to vector<1x128xf32>
    %54 = arith.addf %51, %53 : vector<1x128xf32>
    %c0_28 = arith.constant 0 : index
    %c0_29 = arith.constant 0 : index
    %55 = vector.load %arg5[%c0_28, %c0_29] : memref<1x128xf32, #tpu.memory_space<vmem>>, vector<1x128xf32>
    tpu.vector_store %arg5[%c0_28, %c0_29], %54 {strides = array<i32>} : memref<1x128xf32, #tpu.memory_space<vmem>>, vector<1x128xf32>,
    %c0_i32_30 = arith.constant 0 : i32
    %56 = arith.cmpi eq, %arg0, %c0_i32_30 : i32
    %57 = arith.extui %56 : i1 to i32
    %c0_i32_31 = arith.constant 0 : i32
    %58 = arith.cmpi ne, %57, %c0_i32_31 : i32
    scf.if %58 {
      %c0_32 = arith.constant 0 : index
      %c0_33 = arith.constant 0 : index
      %59 = vector.load %arg5[%c0_32, %c0_33] : memref<1x128xf32, #tpu.memory_space<vmem>>, vector<1x128xf32>
      %cst_34 = arith.constant 1.250000e-01 : f32
      %60 = vector.broadcast %cst_34 : f32 to vector<1x128xf32>
      %61 = arith.mulf %59, %60 : vector<1x128xf32>
      %62 = arith.truncf %61 : vector<1x128xf32> to vector<1x128xbf16>
      %c0_35 = arith.constant 0 : index
      %c640 = arith.constant 640 : index
      %63 = vector.load %arg2[%c0_35, %c640] : memref<128x768xbf16, #tpu.memory_space<vmem>>, vector<128x128xbf16>
      %cst_36 = arith.constant dense<0.000000e+00> : vector<1x128xf32>
      %64 = tpu.matmul %62, %63, %cst_36 {dimension_numbers = #tpu.dot_dimension_numbers<[1], [0], [0], [1], [0, 0, 1, 1], [], []>} : vector<1x128xbf16>, vector<128x128xbf16>, vector<1x128xf32> -> vector<1x128xf32>
      %c0_37 = arith.constant 0 : index
      %c640_38 = arith.constant 640 : index
      %65 = vector.load %arg3[%c0_37, %c640_38] : memref<1x768xf32, #tpu.memory_space<vmem>>, vector<1x128xf32>
      %66 = arith.addf %64, %65 : vector<1x128xf32>
      %c0_39 = arith.constant 0 : index
      %c0_40 = arith.constant 0 : index
      %67 = vector.load %arg4[%c0_39, %c0_40] : memref<2x128xf32, #tpu.memory_space<vmem>>, vector<1x128xf32>
      tpu.vector_store %arg4[%c0_39, %c0_40], %66 {strides = array<i32>} : memref<2x128xf32, #tpu.memory_space<vmem>>, vector<1x128xf32>,
      %c1 = arith.constant 1 : index
      %c0_41 = arith.constant 0 : index
      %68 = vector.load %arg4[%c1, %c0_41] : memref<2x128xf32, #tpu.memory_space<vmem>>, vector<1x128xf32>
      tpu.vector_store %arg4[%c1, %c0_41], %61 {strides = array<i32>} : memref<2x128xf32, #tpu.memory_space<vmem>>, vector<1x128xf32>,
    } else {
    }
    return
  }
  func.func @transform_0(%arg0: i32) -> (i32, i32) {
    %c0_i32 = arith.constant 0 : i32
    %c0_i32_0 = arith.constant 0 : i32
    return %arg0, %c0_i32 : i32, i32
  }
  func.func @transform_1(%arg0: i32) -> (i32, i32) {
    %c0_i32 = arith.constant 0 : i32
    %c0_i32_0 = arith.constant 0 : i32
    %c0_i32_1 = arith.constant 0 : i32
    return %c0_i32, %c0_i32_0 : i32, i32
  }
  func.func @transform_2(%arg0: i32) -> (i32, i32) {
    %c0_i32 = arith.constant 0 : i32
    %c0_i32_0 = arith.constant 0 : i32
    %c0_i32_1 = arith.constant 0 : i32
    return %c0_i32, %c0_i32_0 : i32, i32
  }
  func.func @transform_3(%arg0: i32) -> (i32, i32) {
    %c0_i32 = arith.constant 0 : i32
    %c0_i32_0 = arith.constant 0 : i32
    %c0_i32_1 = arith.constant 0 : i32
    return %c0_i32, %c0_i32_0 : i32, i32
  }
}

</mosaic_0001>

<bundles_post_ra>
// kernel: robust_model_forward.1
= control target key start
LH: loop header
LB: loop body
LE: loop exit
PB: predicated region body
PF: predicated region fallthrough
CT: control target
= control target key end

     0   :  { %8 = vsyncpa [#allocation4], 0  ;;  %s978_s12 = smov [#allocation3]   ;;  %s1110_s0 = inlined_call_operand.vmem [shape: bf16[16,16], index: 0, kind: input, shape index: {}]   ;;  %s1111_s1 = inlined_call_operand.hbm [shape: bf16[128,768], index: 1, kind: input, shape index: {}]   ;;  %s1112_s2 = inlined_call_operand.vmem [shape: f32[1,768], index: 2, kind: input, shape index: {}]   ;;  %s1113_s3 = inlined_call_operand.vmem [shape: f32[2,128], index: 3, kind: output, shape index: {}]  }
   0x1   :  { %s16_s13 = sshll.u32 %s978_s12, 4  ;;  %s954_s16 = scalar_lea.hbm %s1111_s1, 6144  ;;  %s17_s13 = int_to_ptr.vmem [resolvable:$true] %s16_s13 }
   0x2   :  { %p955_p0 = scmp.ne.s32.totalorder %s1111_s1, %s954_s16  ;;  %p958_p1 = scmp.lt.u32.totalorder %s954_s16, %s1111_s1 }
   0x4   :  { %p960_p2 = pnand %p958_p1, %p955_p0 }
   0x6   :  { %963 = shalt.err (!%p960_p2)
}
   0x7   :  { %s964_s21 = scalar_lea.vmem %s17_s13, 6144  ;;  %p969_p4 = scmp.lt.s32.totalorder %s17_s13, %s17_s13 }
   0x8   :  { %p965_p3 = scmp.ne.s32.totalorder %s17_s13, %s964_s21  ;;  %p970_p5 = scmp.lt.s32.totalorder %s964_s21, %s964_s21 }
   0xa   :  { %p971_p6 = por %p970_p5, %p969_p4 }
   0xc   :  { %p972_p7 = pnand %p971_p6, %p965_p3 }
   0xe   :  { %975 = shalt.err (!%p972_p7)
}
   0xf   :  { %s979_s22 = smov 384   ;;  %s980_s23 = smov 24  }
  0x10   :  { %22 = dma.hbm_to_vmem [thread:$0]  %s1111_s1, 6144, %s17_s13, [#allocation4], %s979_s22, %s979_s22, %s980_s23  }
  0x11   :  { %976 = dma.done.wait [#allocation4], 6144  }
  0x12   :  { %977 = vsyncadd [#allocation4], 4294961152  ;;  %v981_v0 = vmov 0.0   ;;  %vm982_vm0 = vmmov 0   ;;  %v912_v1 = vld [vmem:[#allocation3] ss:$24 sps:$4 sm:$0xff]  }
  0x13   :  { %801 = vmatprep.subr.bf16.mxu0 %v981_v0  ;;  %33 = vst [vmem:[#allocation2] sm:$0x1] %v981_v0  ;;  %803 = vmatprep.mubr.msk.bf16.mxu0 %vm982_vm0, %v981_v0  ;;  %v913_v2 = vld [vmem:[%s1110_s0] sm:$0xff]   ;;  %vm56_vm1 = vcmask 130048   ;;  %v915_v4 = vld [vmem:[#allocation3 + $0x34] ss:$24 sps:$4 sm:$0xff]  }
  0x14   :  { %807 = vmatprep.subr.bf16.mxu1 %v981_v0  ;;  %823 = vmatprep.mubr.msk.bf16.mxu1 %vm982_vm0, %v981_v0  ;;  %v914_v3 = vld [vmem:[#allocation3 + $0x4] ss:$24 sps:$4 sm:$0xff]   ;;  %v917_v6 = vld [vmem:[#allocation3 + $0x94] ss:$24 sps:$4 sm:$0xff]   ;;  %v922_v11 = vld [vmem:[#allocation3 + $0x8] ss:$24 sps:$4 sm:$0xff]  }
  0x15   :  { %802 = vmatpush3.bf16.msra.mxu0 %v912_v1  ;;  %808 = vmatpush3.bf16.msra.mxu1 %v914_v3  ;;  %v916_v5 = vld [vmem:[#allocation3 + $0x64] ss:$24 sps:$4 sm:$0xff]   ;;  %v919_v8 = vld [vmem:[#allocation3 + $0xf4] ss:$24 sps:$4 sm:$0xff]   ;;  %v923_v12 = vld [vmem:[#allocation3 + $0x38] ss:$24 sps:$4 sm:$0xff]  }
  0x16   :  { %827 = vmatprep.subr.bf16.mxu0 %v981_v0  ;;  %809 = vmatprep.subr.bf16.mxu1 %v981_v0  ;;  %v918_v7 = vld [vmem:[#allocation3 + $0xc4] ss:$24 sps:$4 sm:$0xff]   ;;  %v921_v10 = vld [vmem:[#allocation3 + $0x154] ss:$24 sps:$4 sm:$0xff]   ;;  %v924_v13 = vld [vmem:[#allocation3 + $0x68] ss:$24 sps:$4 sm:$0xff]  }
  0x17   :  { %v920_v9 = vld [vmem:[#allocation3 + $0x124] ss:$24 sps:$4 sm:$0xff]   ;;  %v925_v14 = vld [vmem:[#allocation3 + $0x98] ss:$24 sps:$4 sm:$0xff]   ;;  %v926_v15 = vld [vmem:[#allocation3 + $0xc8] ss:$24 sps:$4 sm:$0xff]  }
  0x18   :  { %804 = vmatmul.mubr.msk.bf16.vlgmr.msra.gmra.mrb[0].mxu0 %vm56_vm1, %v913_v2  ;;  %v927_v16 = vld [vmem:[#allocation3 + $0xf8] ss:$24 sps:$4 sm:$0xff]   ;;  %v706_v17 = vld [vmem:[%s1112_s2] ss:$0 sm:$0xff]  ;;  %v928_v27 = vld [vmem:[#allocation3 + $0x128] ss:$24 sps:$4 sm:$0xff]  }
  0x19   :  { %843 = vmatprep.mubr.msk.bf16.mxu0 %vm982_vm0, %v981_v0  ;;  %810 = vmatpush3.bf16.msra.mxu1 %v915_v4  ;;  %v929_v28 = vld [vmem:[#allocation3 + $0x158] ss:$24 sps:$4 sm:$0xff]   ;;  %v930_v29 = vld [vmem:[#allocation3 + $0xc] ss:$24 sps:$4 sm:$0xff]   ;;  %v931_v30 = vld [vmem:[#allocation3 + $0x3c] ss:$24 sps:$4 sm:$0xff]  }
  0x1a   :  { %811 = vmatprep.subr.bf16.mxu1 %v981_v0  ;;  %828 = vmatpush3.bf16.msra.mxu0 %v922_v11  ;;  %v932_v31 = vld [vmem:[#allocation3 + $0x6c] ss:$24 sps:$4 sm:$0xff]   ;;  %v933_v32 = vld [vmem:[#allocation3 + $0x9c] ss:$24 sps:$4 sm:$0xff]   ;;  %v710_v35 = vld [vmem:[%s1112_s2 + $0x1] ss:$0 sm:$0xff] }
  0x1b   :  { %829 = vmatprep.subr.bf16.mxu0 %v981_v0  ;;  %v934_v33 = vld [vmem:[#allocation3 + $0xcc] ss:$24 sps:$4 sm:$0xff]   ;;  %v935_v34 = vld [vmem:[#allocation3 + $0xfc] ss:$24 sps:$4 sm:$0xff]   ;;  %v938_v47 = vld [vmem:[#allocation3 + $0x10] ss:$24 sps:$4 sm:$0xff]  }
  0x1c   :  { %v936_v45 = vld [vmem:[#allocation3 + $0x12c] ss:$24 sps:$4 sm:$0xff]   ;;  %v937_v46 = vld [vmem:[#allocation3 + $0x15c] ss:$24 sps:$4 sm:$0xff]   ;;  %v939_v48 = vld [vmem:[#allocation3 + $0x40] ss:$24 sps:$4 sm:$0xff]  }
  0x1d   :  { %812 = vmatpush3.bf16.msra.mxu1 %v916_v5  ;;  %v940_v49 = vld [vmem:[#allocation3 + $0x70] ss:$24 sps:$4 sm:$0xff]   ;;  %v941_v50 = vld [vmem:[#allocation3 + $0xa0] ss:$24 sps:$4 sm:$0xff]  }
  0x1e   :  { %813 = vmatprep.subr.bf16.mxu1 %v981_v0  ;;  %830 = vmatpush3.bf16.msra.mxu0 %v923_v12  ;;  %v942_v51 = vld [vmem:[#allocation3 + $0xd0] ss:$24 sps:$4 sm:$0xff]   ;;  %v943_v52 = vld [vmem:[#allocation3 + $0x100] ss:$24 sps:$4 sm:$0xff]   ;;  %v946_v12 = vld [vmem:[#allocation3 + $0x14] ss:$24 sps:$4 sm:$0xff]  }
  0x1f   :  { %831 = vmatprep.subr.bf16.mxu0 %v981_v0  ;;  %v719_v53 = vld [vmem:[%s1112_s2 + $0x2] ss:$0 sm:$0xff]  ;;  %v944_v63 = vld [vmem:[#allocation3 + $0x130] ss:$24 sps:$4 sm:$0xff]   ;;  %v728_v2 = vld [vmem:[%s1112_s2 + $0x3] ss:$0 sm:$0xff] }
  0x20   :  { %v945_v1 = vld [vmem:[#allocation3 + $0x160] ss:$24 sps:$4 sm:$0xff]  }
  0x21   :  { %814 = vmatpush3.bf16.msra.mxu1 %v917_v6 }
  0x22   :  { %815 = vmatprep.subr.bf16.mxu1 %v981_v0  ;;  %832 = vmatpush3.bf16.msra.mxu0 %v924_v13  ;;  %v947_v13 = vld [vmem:[#allocation3 + $0x44] ss:$24 sps:$4 sm:$0xff]  }
  0x23   :  { %833 = vmatprep.subr.bf16.mxu0 %v981_v0 }
  0x25   :  { %816 = vmatpush3.bf16.msra.mxu1 %v918_v7 }
  0x26   :  { %817 = vmatprep.subr.bf16.mxu1 %v981_v0  ;;  %834 = vmatpush3.bf16.msra.mxu0 %v925_v14  ;;  %v948_v14 = vld [vmem:[#allocation3 + $0x74] ss:$24 sps:$4 sm:$0xff]  }
  0x27   :  { %835 = vmatprep.subr.bf16.mxu0 %v981_v0 }
  0x29   :  { %818 = vmatpush3.bf16.msra.mxu1 %v919_v8 }
  0x2a   :  { %819 = vmatprep.subr.bf16.mxu1 %v981_v0  ;;  %836 = vmatpush3.bf16.msra.mxu0 %v926_v15  ;;  %v949_v15 = vld [vmem:[#allocation3 + $0xa4] ss:$24 sps:$4 sm:$0xff]  }
  0x2b   :  { %837 = vmatprep.subr.bf16.mxu0 %v981_v0 }
  0x2d   :  { %820 = vmatpush3.bf16.msra.mxu1 %v920_v9 }
  0x2e   :  { %821 = vmatprep.subr.bf16.mxu1 %v981_v0  ;;  %838 = vmatpush3.bf16.msra.mxu0 %v927_v16  ;;  %v950_v16 = vld [vmem:[#allocation3 + $0xd4] ss:$24 sps:$4 sm:$0xff]  }
  0x2f   :  { %839 = vmatprep.subr.bf16.mxu0 %v981_v0 }
  0x31   :  { %822 = vmatpush3.bf16.msra.mxu1 %v921_v10 }
  0x32   :  { %847 = vmatprep.subr.bf16.mxu1 %v981_v0  ;;  %840 = vmatpush3.bf16.msra.mxu0 %v928_v27 }
  0x33   :  { %841 = vmatprep.subr.bf16.mxu0 %v981_v0 }
  0x36   :  { %842 = vmatpush3.bf16.msra.mxu0 %v929_v28 }
  0x37   :  { %867 = vmatprep.subr.bf16.mxu0 %v981_v0 }
  0xeb   :  { %v94_v18 = vpop.f32.mrb[0].mxu0 }
  0xec   :  { %v1045_v19 = vadd.f32 %v706_v17, %v94_v18  ;;  %v805_v20 = vpop.f32.mrb[1].mxu0  ;;  %v952_v18 = vld [vmem:[#allocation3 + $0x134] ss:$24 sps:$4 sm:$0xff]  }
  0xed   :  { %v97_v21 = vpop.f32.mrb[2].mxu0  ;;  %v737_v20 = vld [vmem:[%s1112_s2 + $0x4] ss:$0 sm:$0xff] }
  0xee   :  { %v1047_v22 = vadd.f32 %v706_v17, %v97_v21  ;;  %v806_v23 = vpop.f32.mrb[3].mxu0  ;;  %v101_v24 = vmax.f32 %v1045_v19, 0.0  ;;  %v951_v17 = vld [vmem:[#allocation3 + $0x104] ss:$24 sps:$4 sm:$0xff]  }
  0xef   :  { %v953_v19 = vld [vmem:[#allocation3 + $0x164] ss:$24 sps:$4 sm:$0xff]  }
  0xf0   :  { %v102_v25 = vmax.f32 %v1047_v22, 0.0 }
  0xf2   :  { %v103_v26 = vpack.c.bf16 %v102_v25, %v101_v24 }
  0xf4   :  { %824 = vmatmul.mubr.bf16.vlgmr.msra.gmra.mrb[0].mxu1 %v103_v26 }
  0xf5   :  { %863 = vmatprep.mubr.msk.bf16.mxu1 %vm982_vm0, %v981_v0  ;;  %848 = vmatpush3.bf16.msra.mxu1 %v930_v29 }
  0xf6   :  { %849 = vmatprep.subr.bf16.mxu1 %v981_v0 }
  0xf9   :  { %850 = vmatpush3.bf16.msra.mxu1 %v931_v30 }
  0xfa   :  { %851 = vmatprep.subr.bf16.mxu1 %v981_v0 }
  0xfd   :  { %852 = vmatpush3.bf16.msra.mxu1 %v932_v31 }
  0xfe   :  { %853 = vmatprep.subr.bf16.mxu1 %v981_v0 }
 0x101   :  { %854 = vmatpush3.bf16.msra.mxu1 %v933_v32 }
 0x102   :  { %855 = vmatprep.subr.bf16.mxu1 %v981_v0 }
 0x105   :  { %856 = vmatpush3.bf16.msra.mxu1 %v934_v33 }
 0x106   :  { %857 = vmatprep.subr.bf16.mxu1 %v981_v0 }
 0x109   :  { %858 = vmatpush3.bf16.msra.mxu1 %v935_v34 }
 0x10a   :  { %859 = vmatprep.subr.bf16.mxu1 %v981_v0 }
 0x10d   :  { %860 = vmatpush3.bf16.msra.mxu1 %v936_v45 }
 0x10e   :  { %861 = vmatprep.subr.bf16.mxu1 %v981_v0 }
 0x111   :  { %862 = vmatpush3.bf16.msra.mxu1 %v937_v46 }
 0x112   :  { %887 = vmatprep.subr.bf16.mxu1 %v981_v0 }
 0x1c7   :  { %v209_v36 = vpop.f32.mrb[0].mxu1 }
 0x1c8   :  { %v210_v37 = vadd.f32 %v710_v35, %v209_v36  ;;  %v825_v38 = vpop.f32.mrb[1].mxu1 }
 0x1c9   :  { %v212_v39 = vpop.f32.mrb[2].mxu1 }
 0x1ca   :  { %v213_v40 = vadd.f32 %v710_v35, %v212_v39  ;;  %v826_v41 = vpop.f32.mrb[3].mxu1  ;;  %v216_v42 = vmax.f32 %v210_v37, 0.0  ;;  %v578_v35 = vld [vmem:[#allocation2] sm:$0x1] }
 0x1cb   :  { %v610_v41 = vld [vmem:[%s1112_s2 + $0x5] sm:$0x1] }
 0x1cc   :  { %v217_v43 = vmax.f32 %v213_v40, 0.0 }
 0x1ce   :  { %v218_v44 = vpack.c.bf16 %v217_v43, %v216_v42 }
 0x1d0   :  { %844 = vmatmul.mubr.bf16.vlgmr.msra.gmra.mrb[4].mxu0 %v218_v44 }
 0x1d1   :  { %883 = vmatprep.mubr.msk.bf16.mxu0 %vm982_vm0, %v981_v0  ;;  %868 = vmatpush3.bf16.msra.mxu0 %v938_v47 }
 0x1d2   :  { %869 = vmatprep.subr.bf16.mxu0 %v981_v0 }
 0x1d5   :  { %870 = vmatpush3.bf16.msra.mxu0 %v939_v48 }
 0x1d6   :  { %871 = vmatprep.subr.bf16.mxu0 %v981_v0 }
 0x1d9   :  { %872 = vmatpush3.bf16.msra.mxu0 %v940_v49 }
 0x1da   :  { %873 = vmatprep.subr.bf16.mxu0 %v981_v0 }
 0x1dd   :  { %874 = vmatpush3.bf16.msra.mxu0 %v941_v50 }
 0x1de   :  { %875 = vmatprep.subr.bf16.mxu0 %v981_v0 }
 0x1e1   :  { %876 = vmatpush3.bf16.msra.mxu0 %v942_v51 }
 0x1e2   :  { %877 = vmatprep.subr.bf16.mxu0 %v981_v0 }
 0x1e5   :  { %878 = vmatpush3.bf16.msra.mxu0 %v943_v52 }
 0x1e6   :  { %879 = vmatprep.subr.bf16.mxu0 %v981_v0 }
 0x1e9   :  { %880 = vmatpush3.bf16.msra.mxu0 %v944_v63 }
 0x1ea   :  { %881 = vmatprep.subr.bf16.mxu0 %v981_v0 }
 0x1ed   :  { %882 = vmatpush3.bf16.msra.mxu0 %v945_v1 }
 0x2a3   :  { %v324_v54 = vpop.f32.mrb[4].mxu0 }
 0x2a4   :  { %v325_v55 = vadd.f32 %v719_v53, %v324_v54  ;;  %v845_v56 = vpop.f32.mrb[5].mxu0 }
 0x2a5   :  { %v327_v57 = vpop.f32.mrb[6].mxu0 }
 0x2a6   :  { %v328_v58 = vadd.f32 %v719_v53, %v327_v57  ;;  %v846_v59 = vpop.f32.mrb[7].mxu0  ;;  %v331_v60 = vadd.f32 %v325_v55, %v101_v24 }
 0x2a8   :  { %v332_v61 = vadd.f32 %v328_v58, %v102_v25 }
 0x2aa   :  { %v333_v62 = vpack.c.bf16 %v332_v61, %v331_v60 }
 0x2ac   :  { %864 = vmatmul.mubr.bf16.vlgmr.msra.gmra.mrb[4].mxu1 %v333_v62 }
 0x2ad   :  { %903 = vmatprep.mubr.msk.bf16.mxu1 %vm982_vm0, %v981_v0  ;;  %888 = vmatpush3.bf16.msra.mxu1 %v946_v12 }
 0x2ae   :  { %889 = vmatprep.subr.bf16.mxu1 %v981_v0 }
 0x2b1   :  { %890 = vmatpush3.bf16.msra.mxu1 %v947_v13 }
 0x2b2   :  { %891 = vmatprep.subr.bf16.mxu1 %v981_v0 }
 0x2b5   :  { %892 = vmatpush3.bf16.msra.mxu1 %v948_v14 }
 0x2b6   :  { %893 = vmatprep.subr.bf16.mxu1 %v981_v0 }
 0x2b9   :  { %894 = vmatpush3.bf16.msra.mxu1 %v949_v15 }
 0x2ba   :  { %895 = vmatprep.subr.bf16.mxu1 %v981_v0 }
 0x2bd   :  { %896 = vmatpush3.bf16.msra.mxu1 %v950_v16 }
 0x2be   :  { %897 = vmatprep.subr.bf16.mxu1 %v981_v0 }
 0x2c1   :  { %898 = vmatpush3.bf16.msra.mxu1 %v951_v17 }
 0x2c2   :  { %899 = vmatprep.subr.bf16.mxu1 %v981_v0 }
 0x2c5   :  { %900 = vmatpush3.bf16.msra.mxu1 %v952_v18 }
 0x2c6   :  { %901 = vmatprep.subr.bf16.mxu1 %v981_v0 }
 0x2c9   :  { %902 = vmatpush3.bf16.msra.mxu1 %v953_v19 }
 0x37f   :  { %v439_v3 = vpop.f32.mrb[4].mxu1 }
 0x380   :  { %v440_v4 = vadd.f32 %v728_v2, %v439_v3  ;;  %v865_v5 = vpop.f32.mrb[5].mxu1 }
 0x381   :  { %v442_v6 = vpop.f32.mrb[6].mxu1 }
 0x382   :  { %v443_v7 = vadd.f32 %v728_v2, %v442_v6  ;;  %v866_v8 = vpop.f32.mrb[7].mxu1  ;;  %v446_v9 = vmax.f32 %v440_v4, 0.0 }
 0x384   :  { %v447_v10 = vmax.f32 %v443_v7, 0.0 }
 0x386   :  { %v448_v11 = vpack.c.bf16 %v447_v10, %v446_v9 }
 0x388   :  { %884 = vmatmul.mubr.bf16.vlgmr.msra.gmra.mrb[8].mxu0 %v448_v11 }
 0x45b   :  { %v554_v21 = vpop.f32.mrb[8].mxu0 }
 0x45c   :  { %v885_v22 = vpop.f32.mrb[9].mxu0  ;;  %v555_v24 = vadd.f32 %v737_v20, %v554_v21 }
 0x45d   :  { %v557_v23 = vpop.f32.mrb[10].mxu0 }
 0x45e   :  { %v558_v25 = vadd.f32 %v737_v20, %v557_v23  ;;  %v886_v26 = vpop.f32.mrb[11].mxu0  ;;  %v561_v28 = vadd.f32 %v555_v24, %v331_v60 }
 0x460   :  { %v562_v27 = vadd.f32 %v558_v25, %v332_v61 }
 0x462   :  { %v577_v29 = vmul.f32 0.0, %v562_v27 }
 0x464   :  { %v579_v30 = vadd.f32 %v577_v29, %v561_v28 }
 0x466   :  { %v580_v31 = vrot.slane %v579_v30, 4 }
 0x468   :  { %v581_v32 = vadd.f32 %v580_v31, %v579_v30 }
 0x46a   :  { %v582_v33 = vrot.slane %v581_v32, 2 }
 0x46c   :  { %v583_v34 = vadd.f32 %v582_v33, %v581_v32 }
 0x46e   :  { %v584_v0 = vrot.slane %v583_v34, 1 }
 0x470   :  { %v585_v36 = vadd.f32 %v584_v0, %v583_v34 }
 0x472   :  { %v586_v37 = vadd.f32 %v585_v36, %v578_v35 }
 0x474   :  { %587 = vst [vmem:[#allocation2] sm:$0x1] %v586_v37 }
 0x47b   :  { %v591_v38 = vld [vmem:[#allocation2] sm:$0x1] }
 0x47c   :  { %v592_v39 = vmul.f32 0.125, %v591_v38 }
 0x47e   :  { %v593_v40 = vpack.c.bf16 %v592_v39, %v592_v39  ;;  %700 = vst [vmem:[%s1113_s3 + $0x1] sm:$0x1] %v592_v39 }
 0x480   :  { %904 = vmatmul.mubr.bf16.vlgmr.msra.gmra.mrb[8].mxu1 %v593_v40 }
 0x553   :  { %v693_v42 = vpop.f32.mrb[8].mxu1 }
 0x554   :  { %v694_v43 = vadd.f32 %v693_v42, %v610_v41  ;;  %v905_v44 = vpop.f32.mrb[9].mxu1 }
 0x555   :  { %v696_v45 = vpop.f32.mrb[10].mxu1 }
 0x556   :  { %699 = vst [vmem:[%s1113_s3] sm:$0x1] %v694_v43  ;;  %v906_v46 = vpop.f32.mrb[11].mxu1 }
 0x557   :  { %705 = vsyncpa [#allocation4], 1 }

</bundles_post_ra>
